<compile_context>
chip_gen: v6e
topology: v6e:2x2x1
jax: 0.10.0
libtpu: 0.0.40
codegen_flags: <defaults>
</compile_context>

<pallas_src>
import math
import functools

import jax
import jax.numpy as jnp
from jax.experimental import pallas as pl
from jax.experimental.pallas import tpu as pltpu


# ---------------------------------------------------------------------------
# Kernels
# ---------------------------------------------------------------------------
def _pe_add_kernel(x_ref, pe_ref, o_ref):
    # x_ref: (tb, tc) rows of the flattened (B, S*D) view; pe_ref: (1, tc) broadcast row.
    o_ref[...] = x_ref[...] + pe_ref[...]


def _pe_add_dropout_kernel(x_ref, pe_ref, bits_ref, o_ref, *, threshold, scale):
    # Inverted dropout with keep prob (1 - rate):
    #   keep iff bits >= threshold,  threshold = round(rate * 2^16)  ->  P(keep) = 1 - rate.
    # Pure integer compare on pre-generated uint16 bits; no transcendentals, no PRNG state.
    y = x_ref[...] + pe_ref[...]
    keep = bits_ref[...] >= jnp.uint16(threshold)
    scaled = y * jnp.asarray(scale, y.dtype)
    o_ref[...] = jnp.where(keep, scaled, jnp.zeros_like(y)).astype(o_ref.dtype)


# ---------------------------------------------------------------------------
# Parameter (buffer) construction — deterministic, mirrors nn.Module.__init__
# ---------------------------------------------------------------------------
def make_positional_encoding_table(d_model: int, max_len: int = 100) -> jnp.ndarray:
    position = jnp.arange(max_len, dtype=jnp.float32)[:, None]               # (max_len, 1)
    div_term = jnp.exp(
        jnp.arange(0, d_model, 2, dtype=jnp.float32) * (-math.log(10000.0) / d_model)
    )                                                                         # (d_model//2,)
    ang = position * div_term                                                 # (max_len, d_model//2)
    pe = jnp.zeros((max_len, d_model), dtype=jnp.float32)
    pe = pe.at[:, 0::2].set(jnp.sin(ang))
    pe = pe.at[:, 1::2].set(jnp.cos(ang))
    return pe  # (max_len, d_model); PyTorch stores it with a leading singleton batch dim


# ---------------------------------------------------------------------------
# Chip-dependent budgets (best effort; safe defaults if detection fails)
# ---------------------------------------------------------------------------
def _select_budgets():
    budget = 4 << 20          # per-block bytes (v5e/v6e: roofline plateau >= ~1024-wide)
    vmem_limit = 32 << 20     # v5e default scoped VMEM is 16 MiB -> override is load-bearing
    try:
        kind = jax.devices()[0].device_kind.lower()
        if "v7" in kind or "7x" in kind:
            budget = 6 << 20      # 3.2 TB/s HBM -> bigger blocks hide the ~0.35us/step overhead
            vmem_limit = 40 << 20  # still well inside v7x's 64 MiB physical VMEM
    except Exception:
        pass
    return budget, vmem_limit


# ---------------------------------------------------------------------------
# Tiling helper: lane-dense blocks of ~budget bytes each, >= 2 blocks if enough work
# ---------------------------------------------------------------------------
def _choose_tiles(n_rows: int, n_cols: int, itemsize: int, budget: int,
                  min_split_bytes: int = 256 << 10):
    # Column tile: full row if it fits the budget, otherwise a 128-aligned chunk.
    if n_cols * itemsize <= budget:
        tc = n_cols
    else:
        tc = max(128, ((budget // (8 * itemsize)) // 128) * 128)
    # Row tile: as many rows as fit, sublane-aligned (multiple of 8) unless full extent.
    tb = max(1, budget // max(1, tc * itemsize))
    if tb >= n_rows:
        tb = n_rows
    else:
        tb = max(8, (tb // 8) * 8)

    # Megacore guard (v7x): never collapse to a single grid block when there is real work.
    total_bytes = n_rows * n_cols * itemsize
    if (pl.cdiv(n_rows, tb) * pl.cdiv(n_cols, tc) == 1
            and total_bytes > min_split_bytes):
        if n_cols >= 256:
            half = (n_cols + 1) // 2
            tc_split = max(128, ((half + 127) // 128) * 128)
            if tc_split < n_cols:
                tc = tc_split
        if pl.cdiv(n_rows, tb) * pl.cdiv(n_cols, tc) == 1 and n_rows >= 16:
            tb_split = ((((n_rows + 1) // 2) + 7) // 8) * 8
            if tb_split < n_rows:
                tb = tb_split
    return tb, tc


# ---------------------------------------------------------------------------
# Core flat-layout forward on (B, S*D)
# ---------------------------------------------------------------------------
def _forward_flat(x2, pe_row, *, dropout_rate, training, seed, donate_x):
    B, row = x2.shape
    itemsize = jnp.dtype(x2.dtype).itemsize
    budget, vmem_limit = _select_budgets()
    tb, tc = _choose_tiles(B, row, itemsize, budget)

    # Grid: columns outer, batch INNERMOST -> PE block index (0, j) is unchanged across
    # consecutive steps, so Pallas skips re-fetching the PE row (one DMA per column block).
    grid = (pl.cdiv(row, tc), pl.cdiv(B, tb))

    compiler_params = pltpu.CompilerParams(
        dimension_semantics=("parallel", "parallel"),
        vmem_limit_bytes=vmem_limit,
    )
    out_shape = jax.ShapeDtypeStruct((B, row), x2.dtype)
    io_aliases = {0: 0} if donate_x else {}

    x_spec = pl.BlockSpec((tb, tc), lambda j, i: (i, j))
    pe_spec = pl.BlockSpec((1, tc), lambda j, i: (0, j))
    out_spec = pl.BlockSpec((tb, tc), lambda j, i: (i, j))

    if (not training) or dropout_rate == 0.0:
        return pl.pallas_call(
            _pe_add_kernel,
            out_shape=out_shape,
            grid_spec=pltpu.PrefetchScalarGridSpec(
                num_scalar_prefetch=0,
                grid=grid,
                in_specs=[x_spec, pe_spec],
                out_specs=out_spec,
            ),
            compiler_params=compiler_params,
            input_output_aliases=io_aliases,
        )(x2, pe_row)

    rate = float(dropout_rate)
    if rate >= 1.0:
        return jnp.zeros((B, row), dtype=x2.dtype)

    threshold = min(int(round(rate * 65536.0)), 65535)
    scale = 1.0 / (1.0 - rate)
    # Host-side (well-mixed) random bits, streamed as a second lane-dense input.
    bits = jax.random.bits(jax.random.PRNGKey(seed), (B, row), dtype=jnp.uint16)
    kernel = functools.partial(_pe_add_dropout_kernel, threshold=threshold, scale=scale)

    return pl.pallas_call(
        kernel,
        out_shape=out_shape,
        grid_spec=pltpu.PrefetchScalarGridSpec(
            num_scalar_prefetch=0,
            grid=grid,
            in_specs=[x_spec, pe_spec, pl.BlockSpec((tb, tc), lambda j, i: (i, j))],
            out_specs=out_spec,
        ),
        compiler_params=compiler_params,
        input_output_aliases=io_aliases,
    )(x2, pe_row, bits)


# ---------------------------------------------------------------------------
# Functional wrapper (recomputes pe_row each call) and caching module wrapper
# ---------------------------------------------------------------------------
def positional_encoding_forward(x, pe, *, dropout_rate=0.1, training=False, seed=0,
                                donate_x=False):
    """x: (B, S, D) float array, pe: (max_len, D). Returns (B, S, D)."""
    B, S, D = x.shape
    row = S * D
    pe_row = pe[:S, :].astype(x.dtype).reshape(1, row)   # (1, S*D) broadcast row
    x2 = x.reshape(B, row)                                # lane-dense flat view
    out2 = _forward_flat(x2, pe_row, dropout_rate=dropout_rate, training=training,
                         seed=seed, donate_x=donate_x)
    return out2.reshape(B, S, D)


class PositionalEncoding:
    """Mirrors the PyTorch module; caches the cast/flattened PE row per (S, dtype)."""

    def __init__(self, d_model: int, dropout: float = 0.1, max_len: int = 100):
        self.d_model = d_model
        self.dropout_rate = float(dropout)
        self.pe = make_positional_encoding_table(d_model, max_len)   # (max_len, d_model)
        self._pe_row_cache = {}

    def _pe_row(self, S, dtype):
        key = (int(S), jnp.dtype(dtype).name)
        if key not in self._pe_row_cache:
            self._pe_row_cache[key] = (
                self.pe[:S, :].astype(dtype).reshape(1, S * self.d_model)
            )
        return self._pe_row_cache[key]

    def __call__(self, x, *, training=False, seed=0, donate_x=False):
        B, S, D = x.shape
        pe_row = self._pe_row(S, x.dtype)
        x2 = x.reshape(B, S * D)
        out2 = _forward_flat(x2, pe_row, dropout_rate=self.dropout_rate,
                             training=training, seed=seed, donate_x=donate_x)
        return out2.reshape(B, S, D)


# ---------------------------------------------------------------------------
# Demo / correctness check
# ---------------------------------------------------------------------------
if __name__ == "__main__":
    B, S, D = 2, 8, 32
    MAX_LEN = 100
    RATE = 0.1

    key = jax.random.PRNGKey(0)
    x = jax.random.normal(key, (B, S, D), dtype=jnp.float32)

    module = PositionalEncoding(D, dropout=RATE, max_len=MAX_LEN)
    base = x + module.pe[None, :S, :]   # pure-JAX reference of (x + pe)

    # --- Eval-mode forward (dropout is identity, as in inference) -----------
    out = module(x, training=False)
    out = jax.block_until_ready(out)
    assert out.shape == (B, S, D)
    assert out.dtype == x.dtype
    assert jnp.allclose(out, base, atol=1e-6, rtol=1e-6)

    # --- Training-mode forward (inverted dropout, host-generated bits) ------
    out_tr = module(x, training=True, seed=123)
    out_tr = jax.block_until_ready(out_tr)
    assert out_tr.shape == (B, S, D)
    scale = 1.0 / (1.0 - RATE)
    kept = out_tr != 0
    # every kept element must equal the scaled (x + pe) value
    assert jnp.allclose(jnp.where(kept, out_tr, base * scale), base * scale,
                        atol=1e-5, rtol=1e-5)
    # dropped fraction should be roughly RATE (loose statistical bound, 512 elements)
    drop_frac = 1.0 - float(jnp.mean(kept.astype(jnp.float32)))
    assert 0.0 <= drop_frac <= 0.35

    print("KERNEL_OK")
</pallas_src>

<mosaic_0001>
module attributes {stable_mosaic.version = 11 : i64} {
  func.func @_pe_add_kernel(%arg0: i32, %arg1: i32, %arg2: memref<2x256xf32, #tpu.memory_space<vmem>>, %arg3: memref<1x256xf32, #tpu.memory_space<vmem>>, %arg4: memref<2x256xf32, #tpu.memory_space<vmem>>) attributes {dimension_semantics = [#tpu.dimension_semantics<parallel>, #tpu.dimension_semantics<parallel>], iteration_bounds = array<i64: 1, 1>, scalar_prefetch = 0 : i64, scratch_operands = 0 : i64, tpu.core_type = #tpu.core_type<tc>, window_params = [{transform_indices = @transform_0, window_bounds = array<i64: 2, 256>}, {transform_indices = @transform_1, window_bounds = array<i64: 1, 256>}, {transform_indices = @transform_2, window_bounds = array<i64: 2, 256>}]} {
    %c0 = arith.constant 0 : index
    %c0_0 = arith.constant 0 : index
    %0 = vector.load %arg2[%c0, %c0_0] : memref<2x256xf32, #tpu.memory_space<vmem>>, vector<2x256xf32>
    %c0_1 = arith.constant 0 : index
    %c0_2 = arith.constant 0 : index
    %1 = vector.load %arg3[%c0_1, %c0_2] : memref<1x256xf32, #tpu.memory_space<vmem>>, vector<1x256xf32>
    %2 = vector.broadcast %1 : vector<1x256xf32> to vector<2x256xf32>
    %3 = arith.addf %0, %2 : vector<2x256xf32>
    %c0_3 = arith.constant 0 : index
    %c0_4 = arith.constant 0 : index
    %4 = vector.load %arg4[%c0_3, %c0_4] : memref<2x256xf32, #tpu.memory_space<vmem>>, vector<2x256xf32>
    tpu.vector_store %arg4[%c0_3, %c0_4], %3 {strides = array<i32>} : memref<2x256xf32, #tpu.memory_space<vmem>>, vector<2x256xf32>,
    return
  }
  func.func @transform_0(%arg0: i32, %arg1: i32) -> (i32, i32) {
    %c0_i32 = arith.constant 0 : i32
    return %arg1, %arg0 : i32, i32
  }
  func.func @transform_1(%arg0: i32, %arg1: i32) -> (i32, i32) {
    %c0_i32 = arith.constant 0 : i32
    %c0_i32_0 = arith.constant 0 : i32
    return %c0_i32, %arg0 : i32, i32
  }
  func.func @transform_2(%arg0: i32, %arg1: i32) -> (i32, i32) {
    %c0_i32 = arith.constant 0 : i32
    return %arg1, %arg0 : i32, i32
  }
}

</mosaic_0001>

<bundles_post_ra>
// kernel: tpu_custom_call.1
= control target key start
LH: loop header
LB: loop body
LE: loop exit
PB: predicated region body
PF: predicated region fallthrough
CT: control target
= control target key end

     0   :  { %7 = vsyncpa [#allocation3], 0  ;;  %s172_s0 = inlined_call_operand.hbm [shape: f32[2,256], index: 0, kind: input, shape index: {}]   ;;  %s173_s1 = inlined_call_operand.hbm [shape: f32[1,256], index: 1, kind: input, shape index: {}]   ;;  %s174_s2 = inlined_call_operand.hbm [shape: f32[2,256], index: 2, kind: output, shape index: {}]  }
   0x1   :  { %8 = vsyncpa [#allocation6], 0 }
   0x2   :  { %9 = vsyncpa [#allocation4], 0  ;;  %s144_s9 = smov [#allocation2]   ;;  %s145_s11 = smov [#allocation5]  }
   0x3   :  { %s16_s10 = sshll.u32 %s144_s9, 4  ;;  %s26_s12 = sshll.u32 %s145_s11, 4  ;;  %s17_s10 = int_to_ptr.vmem [resolvable:$true] %s16_s10  ;;  %s27_s12 = int_to_ptr.vmem [resolvable:$true] %s26_s12 }
   0x4   :  { %s86_s13 = scalar_lea.vmem %s17_s10, 64  ;;  %p91_p1 = scmp.lt.s32.totalorder %s17_s10, %s17_s10 }
   0x5   :  { %p87_p0 = scmp.ne.s32.totalorder %s17_s10, %s86_s13  ;;  %p92_p2 = scmp.lt.s32.totalorder %s86_s13, %s86_s13 }
   0x7   :  { %p93_p3 = por %p92_p2, %p91_p1 }
   0x9   :  { %p94_p4 = pnand %p93_p3, %p87_p0 }
   0xb   :  { %97 = shalt.err (!%p94_p4)
}
   0xc   :  { %19 = dma.hbm_to_vmem [thread:$0]  %s172_s0, 64, %s17_s10, [#allocation3]  }
   0xd   :  { %s106_s16 = scalar_lea.vmem %s27_s12, 32  ;;  %p111_p6 = scmp.lt.s32.totalorder %s27_s12, %s27_s12 }
   0xe   :  { %p107_p5 = scmp.ne.s32.totalorder %s27_s12, %s106_s16  ;;  %p112_p7 = scmp.lt.s32.totalorder %s106_s16, %s106_s16 }
  0x10   :  { %p113_p8 = por %p112_p7, %p111_p6 }
  0x12   :  { %p114_p9 = pnand %p113_p8, %p107_p5 }
  0x14   :  { %117 = shalt.err (!%p114_p9)
}
  0x15   :  { %29 = dma.hbm_to_vmem [thread:$0]  %s173_s1, 32, %s27_s12, [#allocation6]  }
  0x16   :  { %138 = dma.done.wait [#allocation3], 64  }
  0x17   :  { %139 = vsyncadd [#allocation3], 4294967232 }
  0x18   :  { %140 = dma.done.wait [#allocation6], 32  }
  0x19   :  { %141 = vsyncadd [#allocation6], 4294967264  ;;  %v39_v0 = vlaneseq  ;;  %v146_v1 = vmov 1983009808   ;;  %v37_v7 = vld [vmem:[#allocation5] sm:$0x3] }
  0x1a   :  { %v49_v2 = vunpack.c.l.s4 %v146_v1  ;;  %v36_v12 = vld [vmem:[#allocation2] sm:$0xf]  ;;  %s147_s0 = smov [#allocation7]  }
  0x1b   :  { %v40_v3 = vshrl.u32 %v39_v0, 7  ;;  %s64_s19 = sshll.u32 %s147_s0, 4  ;;  %s65_s19 = int_to_ptr.vmem [resolvable:$true] %s64_s19 }
  0x1c   :  { %v50_v6 = vunpack.c.0.s8 %v49_v2  ;;  %s118_s1 = scalar_lea.vmem %s65_s19, 64  ;;  %p123_p11 = scmp.lt.s32.totalorder %s65_s19, %s65_s19 }
  0x1d   :  { %v41_v4 = vsub.s32 0, %v40_v3  ;;  %v45_v5 = vsub.s32 1, %v40_v3  ;;  %p119_p10 = scmp.ne.s32.totalorder %s65_s19, %s118_s1  ;;  %p124_p12 = scmp.lt.s32.totalorder %s118_s1, %s118_s1 }
  0x1e   :  { %v53_v10 = vsub.s32 %v50_v6, %v40_v3 }
  0x1f   :  { %v42_v8 = vrot.slane %v37_v7, %v41_v4  ;;  %v46_v9 = vrot.slane %v37_v7, %v45_v5  ;;  %p125_p13 = por %p124_p12, %p123_p11 }
  0x21   :  { %v47_v11 = vcombine.low %v42_v8, %v46_v9  ;;  %p126_p0 = pnand %p125_p13, %p119_p10 }
  0x23   :  { %v54_v13 = vrot.slane %v47_v11, %v53_v10 }
  0x25   :  { %v56_v14 = vadd.f32 %v54_v13, %v36_v12 }
  0x27   :  { %57 = vst [vmem:[#allocation7] sm:$0xf] %v56_v14 }
  0x28   :  { %129 = shalt.err (!%p126_p0)
}
  0x29   :  { %67 = dma.vmem_to_hbm [thread:$0]  %s65_s19, 64, %s174_s2, [#allocation4]  }
  0x2a   :  { %142 = dma.done.wait [#allocation4], 64  }
  0x2b   :  { %143 = vsyncadd [#allocation4], 4294967232 }
  0x2c   :  { %71 = vsyncpa [#allocation3], 1 }
  0x2d   :  { %72 = vsyncpa [#allocation6], 1 }
  0x2e   :  { %73 = vsyncpa [#allocation4], 1 }

</bundles_post_ra>
